<compile_context>
chip_gen: v7x
topology: tpu7x:2x2x1
jax: 0.10.0
libtpu: 0.0.40
codegen_flags: <defaults>
</compile_context>

<pallas_src>
import functools

import jax
import jax.numpy as jnp
from jax import lax
from jax.experimental import pallas as pl
from jax.experimental.pallas import tpu as pltpu


_MASK_VALUE = -9.0e15  # torch's -9000000000000000.0


def _mha_kernel(x1_ref, x2_ref, v_ref, adj_ref, o_ref, *,
                head_size, dq, dk, dv):
    # x1_ref: (tq, H*dq) bf16 (already scaled by att_dim**-0.5)
    # x2_ref: (N, H*dk) bf16   v_ref: (N, H*dv) bf16
    # adj_ref: (tq, N)  int8   o_ref: (tq, H*dv) f32
    x1 = x1_ref[...]
    x2 = x2_ref[...]
    vv = v_ref[...]
    # Single widening pass; only the boolean mask stays live across the head
    # loop (no (tq, N) f32 bias copy held for the whole kernel).
    keep = adj_ref[...].astype(jnp.float32) > 0.0

    # TODO(synk): batch heads into one 3-D dot_general (or pad/pack head dims)
    # to use more MXU width; secondary to the softmax-path work at dq=dv=16
    # since the kernel is EUP-bound there.
    for h in range(head_size):  # static unroll: all heads in one grid step
        q = x1[:, h * dq:(h + 1) * dq]          # (tq, dq) bf16, pre-scaled
        k = x2[:, h * dk:(h + 1) * dk]          # (N,  dk) bf16
        vh = vv[:, h * dv:(h + 1) * dv]         # (N,  dv) bf16

        # scores = q @ k^T, contracting the feature axis of both operands
        # (no explicit k.T / XLU transpose), bf16 MXU with f32 accumulation.
        s = lax.dot_general(q, k, (((1,), (1,)), ((), ())),
                            preferred_element_type=jnp.float32)
        s = jnp.where(keep, s, jnp.float32(_MASK_VALUE))

        # Numerically stabilized softmax.  exp in bf16 (binding EUP slot;
        # ~2x on v6e/v7x, widened transparently on v5e); denominator sum in
        # f32; normalization deferred to after the PV matmul.
        m = jnp.max(s, axis=-1, keepdims=True)
        p = jnp.exp((s - m).astype(jnp.bfloat16))            # (tq, N) bf16
        denom = jnp.sum(p.astype(jnp.float32), axis=-1, keepdims=True)

        out_h = jnp.dot(p, vh, preferred_element_type=jnp.float32)
        out_h = out_h * pl.reciprocal(denom, approx=True)    # (tq, dv) f32

        # Lane-dense per-head store directly into the output slice — keeps
        # vreg/VMEM live ranges per-head instead of accumulating all heads.
        o_ref[:, h * dv:(h + 1) * dv] = out_h.astype(o_ref.dtype)


def self_attention_forward(x1, x2, v, adj, *, head_size, qk_dim, q_tile=None):
    """Pallas implementation of Self_Attention.forward.

    x1: (N, qk_dim) float32
    x2: (N, qk_dim) float32
    v : (N, v_dim)  float32
    adj:(N, N)      float32 (dense)
    returns: (N, v_dim) float32
    """
    N = x1.shape[0]
    H = head_size
    dq = x1.shape[1] // H
    dk = x2.shape[1] // H
    dv = v.shape[1] // H
    att_dim = qk_dim // H
    scale = float(att_dim) ** (-0.5)

    # Fold the softmax scale into q in f32 (exactly as PyTorch's q * scale),
    # then cast the MXU operands to bf16; accumulation / softmax math stay f32
    # inside the kernel.
    x1b = (x1 * jnp.float32(scale)).astype(jnp.bfloat16)
    x2b = x2.astype(jnp.bfloat16)
    vb = v.astype(jnp.bfloat16)
    # Ship the N^2 mask as int8 (1 B/elem vs 2 B bf16 bias — the dominant HBM
    # traffic); compare/select is done in-kernel where the VALU has slack.
    adj_i8 = (adj > 0).astype(jnp.int8)

    # Query-row tiling: parallel grid axis (shards over v7x's two TCs at
    # realistic N) and bounds the (tq, N) score/p temporaries.
    # TODO(synk): for very large N also tile the KV axis (flash-style online
    # softmax) so the (tq, N) blocks stay within v7x/v5e VMEM budgets.
    if q_tile is None:
        q_tile = N if N <= 128 else 128
    assert N % q_tile == 0, "demo wrapper assumes N divisible by the query tile"
    grid = (N // q_tile,)

    kernel = functools.partial(_mha_kernel, head_size=H, dq=dq, dk=dk, dv=dv)

    flops = 2 * H * N * N * (dq + dv)
    bytes_accessed = (2 * (x1b.size + x2b.size + vb.size) + adj_i8.size
                      + 4 * N * H * dv)
    cost = pl.CostEstimate(flops=flops,
                           transcendentals=H * N * N,
                           bytes_accessed=bytes_accessed)

    # TODO(synk): x2/v blocks are grid-invariant (index_map == (0, 0)); single-
    # buffering them (pipeline_mode=pl.Buffered(1)) or a one-time DMA into
    # scratch would free more VMEM headroom on v7x.  fp8 QK on v7x and a bf16
    # output on v5e are further options if accuracy / downstream dtype allow.
    out = pl.pallas_call(
        kernel,
        out_shape=jax.ShapeDtypeStruct((N, H * dv), jnp.float32),
        grid_spec=pltpu.PrefetchScalarGridSpec(
            num_scalar_prefetch=0,
            grid=grid,
            in_specs=[
                pl.BlockSpec((q_tile, H * dq), lambda i: (i, 0)),  # x1 (q tile)
                pl.BlockSpec((N, H * dk), lambda i: (0, 0)),       # x2 (all keys)
                pl.BlockSpec((N, H * dv), lambda i: (0, 0)),       # v  (all values)
                pl.BlockSpec((q_tile, N), lambda i: (i, 0)),       # adjacency i8
            ],
            out_specs=pl.BlockSpec((q_tile, H * dv), lambda i: (i, 0)),
        ),
        compiler_params=pltpu.CompilerParams(
            dimension_semantics=("parallel",),
            # Explicit ceiling (not a reservation): well above the v5e 16 MiB /
            # v7x 32 MiB scoped defaults, below every chip's physical VMEM
            # headroom at these block sizes.
            vmem_limit_bytes=64 * 1024 * 1024),
        cost_estimate=cost,
    )(x1b, x2b, vb, adj_i8)

    return out  # already (N, H*dv) — no post-kernel transpose needed


def _reference_forward(x1, x2, v, adj, *, head_size, qk_dim):
    """Pure-JAX f32 reference mirroring the PyTorch forward, for verification."""
    N = x1.shape[0]
    H = head_size
    att_dim = qk_dim // H
    scale = float(att_dim) ** (-0.5)
    q = jnp.transpose(x1.reshape(N, H, -1), (1, 0, 2)) * scale
    k = jnp.transpose(x2.reshape(N, H, -1), (1, 2, 0))
    vv = jnp.transpose(v.reshape(N, H, -1), (1, 0, 2))
    s = jnp.matmul(q, k)
    s = jnp.where(adj > 0, s, jnp.full_like(s, _MASK_VALUE))
    p = jax.nn.softmax(s, axis=-1)
    o = jnp.matmul(p, vv)
    return jnp.transpose(o, (1, 0, 2)).reshape(N, -1)


if __name__ == "__main__":
    # Module hyperparameters (small, consistent with forward's shape logic).
    in_features = 32
    qk_dim = 32
    v_dim = 32
    head_size = 2
    N = 8  # number of nodes ("batch_size" in the PyTorch code)

    key = jax.random.PRNGKey(0)
    k1, k2, k3, k4 = jax.random.split(key, 4)

    x1 = jax.random.normal(k1, (N, qk_dim), jnp.float32)
    x2 = jax.random.normal(k2, (N, qk_dim), jnp.float32)
    v = jax.random.normal(k3, (N, v_dim), jnp.float32)
    # Random sparse-ish dense adjacency (self-loops so no row is fully masked).
    adj = (jax.random.uniform(k4, (N, N)) > 0.5).astype(jnp.float32)
    adj = jnp.maximum(adj, jnp.eye(N, dtype=jnp.float32))

    out = self_attention_forward(x1, x2, v, adj,
                                 head_size=head_size, qk_dim=qk_dim)
    out = jax.block_until_ready(out)

    ref = _reference_forward(x1, x2, v, adj,
                             head_size=head_size, qk_dim=qk_dim)
    assert out.shape == (N, v_dim), out.shape
    # bf16 MXU inputs, bf16 exp and approx reciprocal => loosened tolerance vs
    # the f32 reference (not bit-parity with the f32 torch path by design).
    assert jnp.allclose(out, ref, atol=5e-2, rtol=5e-2), "mismatch vs reference"

    print("KERNEL_OK")
</pallas_src>

<mosaic_0001>
module attributes {stable_mosaic.version = 11 : i64} {
  func.func @_mha_kernel(%arg0: i32, %arg1: memref<8x32xbf16, #tpu.memory_space<vmem>>, %arg2: memref<8x32xbf16, #tpu.memory_space<vmem>>, %arg3: memref<8x32xbf16, #tpu.memory_space<vmem>>, %arg4: memref<8x8xi8, #tpu.memory_space<vmem>>, %arg5: memref<8x32xf32, #tpu.memory_space<vmem>>) attributes {dimension_semantics = [#tpu.dimension_semantics<parallel>], iteration_bounds = array<i64: 1>, scalar_prefetch = 0 : i64, scratch_operands = 0 : i64, tpu.core_type = #tpu.core_type<tc>, window_params = [{transform_indices = @transform_0, window_bounds = array<i64: 8, 32>}, {pipeline_mode = #tpu.pipeline_mode<synchronous>, transform_indices = @transform_1, window_bounds = array<i64: 8, 32>}, {pipeline_mode = #tpu.pipeline_mode<synchronous>, transform_indices = @transform_2, window_bounds = array<i64: 8, 32>}, {transform_indices = @transform_3, window_bounds = array<i64: 8, 8>}, {transform_indices = @transform_4, window_bounds = array<i64: 8, 32>}]} {
    %c0 = arith.constant 0 : index
    %c0_0 = arith.constant 0 : index
    %0 = vector.load %arg1[%c0, %c0_0] : memref<8x32xbf16, #tpu.memory_space<vmem>>, vector<8x32xbf16>
    %c0_1 = arith.constant 0 : index
    %c0_2 = arith.constant 0 : index
    %1 = vector.load %arg2[%c0_1, %c0_2] : memref<8x32xbf16, #tpu.memory_space<vmem>>, vector<8x32xbf16>
    %c0_3 = arith.constant 0 : index
    %c0_4 = arith.constant 0 : index
    %2 = vector.load %arg3[%c0_3, %c0_4] : memref<8x32xbf16, #tpu.memory_space<vmem>>, vector<8x32xbf16>
    %c0_5 = arith.constant 0 : index
    %c0_6 = arith.constant 0 : index
    %3 = vector.load %arg4[%c0_5, %c0_6] : memref<8x8xi8, #tpu.memory_space<vmem>>, vector<8x8xi8>
    %4 = arith.sitofp %3 : vector<8x8xi8> to vector<8x8xf32>
    %cst = arith.constant 0.000000e+00 : f32
    %5 = vector.broadcast %cst : f32 to vector<8x8xf32>
    %6 = arith.cmpf ogt, %4, %5 : vector<8x8xf32>
    %7 = vector.extract_strided_slice %0 {offsets = [0, 0], sizes = [8, 16], strides = [1, 1]} : vector<8x32xbf16> to vector<8x16xbf16>
    %8 = vector.extract_strided_slice %1 {offsets = [0, 0], sizes = [8, 16], strides = [1, 1]} : vector<8x32xbf16> to vector<8x16xbf16>
    %9 = vector.extract_strided_slice %2 {offsets = [0, 0], sizes = [8, 16], strides = [1, 1]} : vector<8x32xbf16> to vector<8x16xbf16>
    %cst_7 = arith.constant dense<0.000000e+00> : vector<8x8xf32>
    %10 = tpu.matmul %7, %8, %cst_7 {dimension_numbers = #tpu.dot_dimension_numbers<[1], [1], [0], [0], [0, 0, 1, 0], [], []>} : vector<8x16xbf16>, vector<8x16xbf16>, vector<8x8xf32> -> vector<8x8xf32>
    %cst_8 = arith.constant -9.000000e+15 : f32
    %11 = vector.broadcast %cst_8 : f32 to vector<8x8xf32>
    %12 = arith.select %6, %10, %11 : vector<8x8xi1>, vector<8x8xf32>
    %cst_9 = arith.constant dense<0xFF800000> : vector<8xf32>
    %13 = vector.multi_reduction <maximumf>, %12, %cst_9 [1] : vector<8x8xf32> to vector<8xf32>
    %14 = vector.shape_cast %13 : vector<8xf32> to vector<8x1xf32>
    %15 = vector.broadcast %14 : vector<8x1xf32> to vector<8x8xf32>
    %16 = arith.subf %12, %15 : vector<8x8xf32>
    %17 = arith.truncf %16 : vector<8x8xf32> to vector<8x8xbf16>
    %18 = math.exp %17 : vector<8x8xbf16>
    %19 = arith.extf %18 : vector<8x8xbf16> to vector<8x8xf32>
    %cst_10 = arith.constant dense<0.000000e+00> : vector<8xf32>
    %20 = vector.multi_reduction <add>, %19, %cst_10 [1] : vector<8x8xf32> to vector<8xf32>
    %21 = vector.shape_cast %20 : vector<8xf32> to vector<8x1xf32>
    %cst_11 = arith.constant dense<0.000000e+00> : vector<8x16xf32>
    %22 = tpu.matmul %18, %9, %cst_11 {dimension_numbers = #tpu.dot_dimension_numbers<[1], [0], [0], [1], [0, 0, 1, 1], [], []>} : vector<8x8xbf16>, vector<8x16xbf16>, vector<8x16xf32> -> vector<8x16xf32>
    %23 = tpu.reciprocal %21 {approx = true} : vector<8x1xf32> -> vector<8x1xf32>
    %24 = vector.broadcast %23 : vector<8x1xf32> to vector<8x16xf32>
    %25 = arith.mulf %22, %24 : vector<8x16xf32>
    %c0_12 = arith.constant 0 : index
    %c0_13 = arith.constant 0 : index
    %26 = vector.load %arg5[%c0_12, %c0_13] : memref<8x32xf32, #tpu.memory_space<vmem>>, vector<8x16xf32>
    tpu.vector_store %arg5[%c0_12, %c0_13], %25 {strides = array<i32>} : memref<8x32xf32, #tpu.memory_space<vmem>>, vector<8x16xf32>,
    %27 = vector.extract_strided_slice %0 {offsets = [0, 16], sizes = [8, 16], strides = [1, 1]} : vector<8x32xbf16> to vector<8x16xbf16>
    %28 = vector.extract_strided_slice %1 {offsets = [0, 16], sizes = [8, 16], strides = [1, 1]} : vector<8x32xbf16> to vector<8x16xbf16>
    %29 = vector.extract_strided_slice %2 {offsets = [0, 16], sizes = [8, 16], strides = [1, 1]} : vector<8x32xbf16> to vector<8x16xbf16>
    %cst_14 = arith.constant dense<0.000000e+00> : vector<8x8xf32>
    %30 = tpu.matmul %27, %28, %cst_14 {dimension_numbers = #tpu.dot_dimension_numbers<[1], [1], [0], [0], [0, 0, 1, 0], [], []>} : vector<8x16xbf16>, vector<8x16xbf16>, vector<8x8xf32> -> vector<8x8xf32>
    %cst_15 = arith.constant -9.000000e+15 : f32
    %31 = vector.broadcast %cst_15 : f32 to vector<8x8xf32>
    %32 = arith.select %6, %30, %31 : vector<8x8xi1>, vector<8x8xf32>
    %cst_16 = arith.constant dense<0xFF800000> : vector<8xf32>
    %33 = vector.multi_reduction <maximumf>, %32, %cst_16 [1] : vector<8x8xf32> to vector<8xf32>
    %34 = vector.shape_cast %33 : vector<8xf32> to vector<8x1xf32>
    %35 = vector.broadcast %34 : vector<8x1xf32> to vector<8x8xf32>
    %36 = arith.subf %32, %35 : vector<8x8xf32>
    %37 = arith.truncf %36 : vector<8x8xf32> to vector<8x8xbf16>
    %38 = math.exp %37 : vector<8x8xbf16>
    %39 = arith.extf %38 : vector<8x8xbf16> to vector<8x8xf32>
    %cst_17 = arith.constant dense<0.000000e+00> : vector<8xf32>
    %40 = vector.multi_reduction <add>, %39, %cst_17 [1] : vector<8x8xf32> to vector<8xf32>
    %41 = vector.shape_cast %40 : vector<8xf32> to vector<8x1xf32>
    %cst_18 = arith.constant dense<0.000000e+00> : vector<8x16xf32>
    %42 = tpu.matmul %38, %29, %cst_18 {dimension_numbers = #tpu.dot_dimension_numbers<[1], [0], [0], [1], [0, 0, 1, 1], [], []>} : vector<8x8xbf16>, vector<8x16xbf16>, vector<8x16xf32> -> vector<8x16xf32>
    %43 = tpu.reciprocal %41 {approx = true} : vector<8x1xf32> -> vector<8x1xf32>
    %44 = vector.broadcast %43 : vector<8x1xf32> to vector<8x16xf32>
    %45 = arith.mulf %42, %44 : vector<8x16xf32>
    %c0_19 = arith.constant 0 : index
    %c16 = arith.constant 16 : index
    %46 = vector.load %arg5[%c0_19, %c16] : memref<8x32xf32, #tpu.memory_space<vmem>>, vector<8x16xf32>
    tpu.vector_store %arg5[%c0_19, %c16], %45 {strides = array<i32>} : memref<8x32xf32, #tpu.memory_space<vmem>>, vector<8x16xf32>,
    return
  }
  func.func @transform_0(%arg0: i32) -> (i32, i32) {
    %c0_i32 = arith.constant 0 : i32
    %c0_i32_0 = arith.constant 0 : i32
    return %arg0, %c0_i32 : i32, i32
  }
  func.func @transform_1(%arg0: i32) -> (i32, i32) {
    %c0_i32 = arith.constant 0 : i32
    %c0_i32_0 = arith.constant 0 : i32
    %c0_i32_1 = arith.constant 0 : i32
    return %c0_i32, %c0_i32_0 : i32, i32
  }
  func.func @transform_2(%arg0: i32) -> (i32, i32) {
    %c0_i32 = arith.constant 0 : i32
    %c0_i32_0 = arith.constant 0 : i32
    %c0_i32_1 = arith.constant 0 : i32
    return %c0_i32, %c0_i32_0 : i32, i32
  }
  func.func @transform_3(%arg0: i32) -> (i32, i32) {
    %c0_i32 = arith.constant 0 : i32
    %c0_i32_0 = arith.constant 0 : i32
    return %arg0, %c0_i32 : i32, i32
  }
  func.func @transform_4(%arg0: i32) -> (i32, i32) {
    %c0_i32 = arith.constant 0 : i32
    %c0_i32_0 = arith.constant 0 : i32
    return %arg0, %c0_i32 : i32, i32
  }
}

</mosaic_0001>

<bundles_post_ra>
// kernel: tpu_custom_call.1
= control target key start
LH: loop header
LB: loop body
LE: loop exit
PB: predicated region body
PF: predicated region fallthrough
CT: control target
= control target key end

     0   :  { %9 = vsyncpa [#allocation3], 0  ;;  %s619_s0 = inlined_call_operand.hbm [shape: bf16[8,32], index: 0, kind: input, shape index: {}]   ;;  %s620_s1 = inlined_call_operand.hbm [shape: bf16[8,32], index: 1, kind: input, shape index: {}]   ;;  %s621_s2 = inlined_call_operand.hbm [shape: bf16[8,32], index: 2, kind: input, shape index: {}]   ;;  %s622_s3 = inlined_call_operand.hbm [shape: s8[8,8], index: 3, kind: input, shape index: {}]   ;;  %s623_s4 = inlined_call_operand.hbm [shape: f32[8,32], index: 4, kind: output, shape index: {}]  }
   0x1   :  { %10 = vsyncpa [#allocation6], 0 }
   0x2   :  { %11 = vsyncpa [#allocation9], 0 }
   0x3   :  { %12 = vsyncpa [#allocation4], 0  ;;  %s506_s15 = smov [#allocation5]   ;;  %s507_s17 = smov [#allocation2]  }
   0x4   :  { %s29_s16 = sshll.u32 %s506_s15, 4  ;;  %s19_s18 = sshll.u32 %s507_s17, 4  ;;  %s30_s16 = int_to_ptr.vmem [resolvable:$true] %s29_s16  ;;  %s20_s18 = int_to_ptr.vmem [resolvable:$true] %s19_s18 }
   0x5   :  { %s388_s21 = scalar_lea.hbm %s620_s1, 64 }
   0x6   :  { %p389_p0 = scmp.ne.s32.totalorder %s620_s1, %s388_s21  ;;  %p392_p1 = scmp.lt.u32.totalorder %s388_s21, %s620_s1 }
   0x8   :  { %p394_p2 = pnand %p392_p1, %p389_p0 }
   0xa   :  { %397 = shalt.err (!%p394_p2)
}
   0xb   :  { %s398_s26 = scalar_lea.vmem %s30_s16, 64  ;;  %p403_p4 = scmp.lt.s32.totalorder %s30_s16, %s30_s16 }
   0xc   :  { %p399_p3 = scmp.ne.s32.totalorder %s30_s16, %s398_s26  ;;  %p404_p5 = scmp.lt.s32.totalorder %s398_s26, %s398_s26 }
   0xe   :  { %p405_p6 = por %p404_p5, %p403_p4 }
  0x10   :  { %p406_p7 = pnand %p405_p6, %p399_p3 }
  0x12   :  { %409 = shalt.err (!%p406_p7)
}
  0x13   :  { %32 = dma.hbm_to_vmem [thread:$0]  %s620_s1, 64, %s30_s16, [#allocation6]  }
  0x14   :  { %s410_s5 = scalar_lea.hbm %s619_s0, 64 }
  0x15   :  { %p411_p8 = scmp.ne.s32.totalorder %s619_s0, %s410_s5  ;;  %p414_p9 = scmp.lt.u32.totalorder %s410_s5, %s619_s0 }
  0x17   :  { %p416_p10 = pnand %p414_p9, %p411_p8 }
  0x19   :  { %419 = shalt.err (!%p416_p10)
}
  0x1a   :  { %s420_s10 = scalar_lea.vmem %s20_s18, 64  ;;  %p425_p12 = scmp.lt.s32.totalorder %s20_s18, %s20_s18 }
  0x1b   :  { %p421_p11 = scmp.ne.s32.totalorder %s20_s18, %s420_s10  ;;  %p426_p13 = scmp.lt.s32.totalorder %s420_s10, %s420_s10 }
  0x1d   :  { %p427_p0 = por %p426_p13, %p425_p12 }
  0x1f   :  { %p428_p1 = pnand %p427_p0, %p421_p11 }
  0x21   :  { %431 = shalt.err (!%p428_p1)
}
  0x22   :  { %22 = dma.hbm_to_vmem [thread:$0]  %s619_s0, 64, %s20_s18, [#allocation3]  }
  0x23   :  { %s508_s12 = smov [#allocation7]   ;;  %s509_s14 = smov [#allocation8]  }
  0x24   :  { %s39_s13 = sshll.u32 %s508_s12, 4  ;;  %s49_s15 = sshll.u32 %s509_s14, 4  ;;  %s40_s13 = int_to_ptr.vmem [resolvable:$true] %s39_s13  ;;  %s50_s15 = int_to_ptr.vmem [resolvable:$true] %s49_s15 }
  0x25   :  { %s432_s19 = scalar_lea.hbm %s621_s2, 64 }
  0x26   :  { %p433_p2 = scmp.ne.s32.totalorder %s621_s2, %s432_s19  ;;  %p436_p3 = scmp.lt.u32.totalorder %s432_s19, %s621_s2 }
  0x28   :  { %p438_p4 = pnand %p436_p3, %p433_p2 }
  0x2a   :  { %441 = shalt.err (!%p438_p4)
}
  0x2b   :  { %s442_s0 = scalar_lea.vmem %s40_s13, 64  ;;  %p447_p6 = scmp.lt.s32.totalorder %s40_s13, %s40_s13 }
  0x2c   :  { %p443_p5 = scmp.ne.s32.totalorder %s40_s13, %s442_s0  ;;  %p448_p7 = scmp.lt.s32.totalorder %s442_s0, %s442_s0 }
  0x2e   :  { %p449_p8 = por %p448_p7, %p447_p6 }
  0x30   :  { %p450_p9 = pnand %p449_p8, %p443_p5 }
  0x32   :  { %453 = shalt.err (!%p450_p9)
}
  0x33   :  { %42 = dma.hbm_to_vmem [thread:$0]  %s621_s2, 64, %s40_s13, [#allocation6]  }
  0x34   :  { %s454_s27 = scalar_lea.hbm %s622_s3, 32 }
  0x35   :  { %p455_p10 = scmp.ne.s32.totalorder %s622_s3, %s454_s27  ;;  %p458_p11 = scmp.lt.u32.totalorder %s454_s27, %s622_s3 }
  0x37   :  { %p460_p12 = pnand %p458_p11, %p455_p10 }
  0x39   :  { %463 = shalt.err (!%p460_p12)
}
  0x3a   :  { %s464_s6 = scalar_lea.vmem %s50_s15, 32  ;;  %p469_p0 = scmp.lt.s32.totalorder %s50_s15, %s50_s15 }
  0x3b   :  { %p465_p13 = scmp.ne.s32.totalorder %s50_s15, %s464_s6  ;;  %p470_p1 = scmp.lt.s32.totalorder %s464_s6, %s464_s6 }
  0x3d   :  { %p471_p2 = por %p470_p1, %p469_p0 }
  0x3f   :  { %p472_p3 = pnand %p471_p2, %p465_p13 }
  0x41   :  { %475 = shalt.err (!%p472_p3)
}
  0x42   :  { %52 = dma.hbm_to_vmem [thread:$0]  %s622_s3, 32, %s50_s15, [#allocation9]  }
  0x43   :  { %498 = dma.done.wait [#allocation3], 64  }
  0x44   :  { %499 = vsyncadd [#allocation3], 4294967232 }
  0x45   :  { %500 = dma.done.wait [#allocation6], 128  }
  0x46   :  { %501 = vsyncadd [#allocation6], 4294967168 }
  0x47   :  { %502 = dma.done.wait [#allocation9], 32  }
  0x48   :  { %503 = vsyncadd [#allocation9], 4294967264  ;;  %v510_v0 = vmov 0.0   ;;  %vm511_vm0 = vmmov 0   ;;  %vm73_vm1 = vcmask 130048   ;;  %s512_s3 = smov 112  }
  0x49   :  { %344 = vmatprep.subr.bf16.mxu0 %v510_v0  ;;  %346 = vmatprep.mubr.msk.bf16.mxu0 %vm511_vm0, %v510_v0  ;;  %v67_v1 = vld [vmem:[#allocation5] sm:$0xf]  ;;  %v66_v3 = vld [vmem:[#allocation2] sm:$0xf]  ;;  %v69_v5 = vld [vmem:[#allocation8] sm:$0x3] }
  0x4a   :  { %350 = vmatprep.subr.bf16.mxu1 %v510_v0  ;;  %352 = vmatprep.mubr.msk.bf16.mxu1 %vm511_vm0, %v510_v0  ;;  %v78_v2 = vsel %vm73_vm1, %v67_v1, 0  ;;  %v331_v4 = vcombine.low %v66_v3, %v66_v3  ;;  %v70_v6 = vunpack.c.0.s8 %v69_v5  ;;  %vm121_vm3 = vcmask 64512   ;;  %v68_v15 = vld [vmem:[#allocation7] sm:$0xf]  ;;  %s513_s8 = smov 16   ;;  %s514_s9 = smov [#allocation10]  }
  0x4b   :  { %345 = vmatpush3.bf16.xpose.msra.mxu0 %v78_v2  ;;  %v332_v14 = vcombine.low %v67_v1, %v67_v1  ;;  %vm137_vm4 = vcmask 1043456   ;;  %v334_v17 = vcombine.low %v68_v15, %v68_v15  ;;  %s318_s10 = sshll.u32 %s514_s9, 4  ;;  %vm310_vm5 = vcmask 261248   ;;  %s319_s10 = int_to_ptr.vmem [resolvable:$true] %s318_s10 }
  0x4c   :  { %362 = vmatprep.subr.bf16.mxu0 %v510_v0  ;;  %187 = vrot.lane.b32.xlu1 %v331_v4, %s512_s3  ;;  %v71_v7 = vcvt.s32.f32 %v70_v6  ;;  %v139_v16 = vsel %vm137_vm4, %v68_v15, 0  ;;  %s476_s1 = scalar_lea.vmem %s319_s10, 128  ;;  %p481_p5 = scmp.lt.s32.totalorder %s319_s10, %s319_s10 }
  0x4d   :  { %351 = vmatpush3.bf16.msra.mxu1 %v139_v16  ;;  %p477_p4 = scmp.ne.s32.totalorder %s319_s10, %s476_s1  ;;  %p482_p6 = scmp.lt.s32.totalorder %s476_s1, %s476_s1 }
  0x4e   :  { %vm72_vm2 = vcmp.gt.f32.partialorder %v71_v7, 0.0  ;;  %356 = vmatprep.subr.bf16.mxu1 %v510_v0 }
  0x4f   :  { %p483_p7 = por %p482_p6, %p481_p5 }
  0x51   :  { %p484_p8 = pnand %p483_p7, %p477_p4 }
  0x52   :  { %347 = vmatmul.mubr.msk.bf16.vlgmr.msra.gmra.mrb[0].mxu0 %vm73_vm1, %v66_v3 }
  0x53   :  { %364 = vmatprep.mubr.msk.bf16.mxu0 %vm511_vm0, %v510_v0 }
  0xbe   :  { %v188_v25 = vpop.permute.xlu1 %187 }
 0x125   :  { %v114_v8 = vpop.f32.mrb[0].mxu0 }
 0x126   :  { %v120_v9 = vsel %vm72_vm2, %v114_v8, -9e+15  ;;  %v348_v10 = vpop.f32.mrb[1].mxu0 }
 0x127   :  { %v117_v11 = vpop.f32.mrb[2].mxu0  ;;  %v122_v12 = vsel %vm121_vm3, %v120_v9, -inf }
 0x128   :  { %123 = vmax.xlane.f32.xlu0 %v122_v12  ;;  %v349_v13 = vpop.f32.mrb[3].mxu0 }
 0x13e   :  { %192 = vrot.lane.b32.xlu0 %v332_v14, %s512_s3 }
 0x142   :  { %256 = vrot.lane.b32.xlu0 %v334_v17, %s512_s3 }
 0x1b5   :  { %v124_v18 = vpop.xlane.xlu0 %123 }
 0x1b6   :  { %v125_v19 = vsub.f32 %v120_v9, %v124_v18 }
 0x1b8   :  { %v126_v20 = vpack.c.bf16 %v125_v19, %v125_v19 }
 0x1b9   :  { %v193_v22 = vpop.permute.xlu0 %192 }
 0x1ba   :  { %v128_v21 = vmul.bf16 1069105081, %v126_v20  ;;  %v198_v23 = vsel %vm73_vm1, %v193_v22, 0 }
 0x1bc   :  { %380 = vpow.bf16 %v128_v21 }
 0x1bd   :  { %v257_v38 = vpop.permute.xlu0 %256 }
 0x1be   :  { %v262_v39 = vsel %vm137_vm4, %v257_v38, 0 }
 0x1bf   :  { %363 = vmatpush3.bf16.msra.mxu0 %v262_v39 }
 0x1c7   :  { %v381_v24 = vpop.eup %380 }
 0x1c8   :  { %353 = vmatmul.mubr.msk.bf16.vlgmr.msra.gmra.mrb[0].mxu1 %vm121_vm3, %v381_v24  ;;  %v130_v35 = vunpack.c.l.bf16 %v381_v24 }
 0x1c9   :  { %357 = vmatpush3.bf16.xpose.msra.mxu1 %v198_v23  ;;  %358 = vmatprep.mubr.msk.bf16.mxu1 %vm511_vm0, %v510_v0 }
 0x1ca   :  { %v131_v37 = vsel %vm121_vm3, %v130_v35, 0.0 }
 0x1d0   :  { %359 = vmatmul.mubr.msk.bf16.vlgmr.msra.gmra.mrb[4].mxu1 %vm73_vm1, %v188_v25 }
 0x29b   :  { %v175_v26 = vpop.f32.mrb[0].mxu1 }
 0x29c   :  { %v354_v27 = vpop.f32.mrb[1].mxu1 }
 0x29d   :  { %v178_v28 = vpop.f32.mrb[2].mxu1 }
 0x29e   :  { %v355_v29 = vpop.f32.mrb[3].mxu1 }
 0x2a3   :  { %v234_v30 = vpop.f32.mrb[4].mxu1 }
 0x2a4   :  { %v240_v31 = vsel %vm72_vm2, %v234_v30, -9e+15  ;;  %v360_v32 = vpop.f32.mrb[5].mxu1 }
 0x2a5   :  { %v237_v33 = vpop.f32.mrb[6].mxu1  ;;  %v241_v34 = vsel %vm121_vm3, %v240_v31, -inf }
 0x2a6   :  { %242 = vmax.xlane.f32.xlu1 %v241_v34  ;;  %v361_v36 = vpop.f32.mrb[7].mxu1 }
 0x2aa   :  { %132 = vadd.xlane.f32.xlu1 %v131_v37 }
 0x333   :  { %v243_v40 = vpop.xlane.xlu1 %242 }
 0x334   :  { %v244_v41 = vsub.f32 %v240_v31, %v243_v40 }
 0x336   :  { %v245_v42 = vpack.c.bf16 %v244_v41, %v244_v41 }
 0x337   :  { %v133_v43 = vpop.xlane.xlu1 %132 }
 0x338   :  { %v247_v44 = vmul.bf16 1069105081, %v245_v42  ;;  %382 = vrcp.f32 %v133_v43 }
 0x33a   :  { %384 = vpow.bf16 %v247_v44 }
 0x342   :  { %v383_v45 = vpop.eup %382 }
 0x343   :  { %v182_v46 = vmul.f32 %v383_v45, %v175_v26 }
 0x345   :  { %v385_v47 = vpop.eup %384  ;;  %183 = vst.msk [vmem:[#allocation10] sm:$0xff] %vm73_vm1, %v182_v46 }
 0x346   :  { %365 = vmatmul.mubr.msk.bf16.vlgmr.msra.gmra.mrb[4].mxu0 %vm121_vm3, %v385_v47  ;;  %v249_v48 = vunpack.c.l.bf16 %v385_v47 }
 0x348   :  { %v250_v49 = vsel %vm121_vm3, %v249_v48, 0.0 }
 0x349   :  { %251 = vadd.xlane.f32.xlu0 %v250_v49 }
 0x3d6   :  { %v252_v50 = vpop.xlane.xlu0 %251 }
 0x3d7   :  { %386 = vrcp.f32 %v252_v50 }
 0x3e1   :  { %v387_v51 = vpop.eup %386 }
 0x419   :  { %v298_v52 = vpop.f32.mrb[4].mxu0 }
 0x41a   :  { %v305_v53 = vmul.f32 %v387_v51, %v298_v52  ;;  %v366_v54 = vpop.f32.mrb[5].mxu0 }
 0x41b   :  { %v301_v55 = vpop.f32.mrb[6].mxu0 }
 0x41c   :  { %307 = vrot.lane.b32.xlu1 %v305_v53, %s513_s8  ;;  %v367_v56 = vpop.f32.mrb[7].mxu0 }
 0x48e   :  { %v308_v57 = vpop.permute.xlu1 %307 }
 0x48f   :  { %311 = vst.msk [vmem:[#allocation10] sm:$0xff] %vm310_vm5, %v308_v57 }
 0x490   :  { %487 = shalt.err (!%p484_p8)
}
 0x491   :  { %s488_s13 = scalar_lea.hbm %s623_s4, 128 }
 0x492   :  { %p489_p9 = scmp.ne.s32.totalorder %s623_s4, %s488_s13  ;;  %p492_p10 = scmp.lt.u32.totalorder %s488_s13, %s623_s4 }
 0x494   :  { %p494_p11 = pnand %p492_p10, %p489_p9 }
 0x496   :  { %497 = shalt.err (!%p494_p11)
}
 0x497   :  { %321 = dma.vmem_to_hbm [thread:$0]  %s319_s10, 128, %s623_s4, [#allocation4]  }
 0x498   :  { %504 = dma.done.wait [#allocation4], 128  }
 0x499   :  { %505 = vsyncadd [#allocation4], 4294967168 }
 0x49a   :  { %325 = vsyncpa [#allocation3], 1 }
 0x49b   :  { %326 = vsyncpa [#allocation6], 1 }
 0x49c   :  { %327 = vsyncpa [#allocation9], 1 }
 0x49d   :  { %328 = vsyncpa [#allocation4], 1 }

</bundles_post_ra>
